<compile_context>
chip_gen: v7x
topology: tpu7x:2x2x1
jax: 0.10.0
libtpu: 0.0.40
codegen_flags: <defaults>
</compile_context>

<pallas_src>
import jax
import jax.numpy as jnp
from jax import lax
from jax.experimental import pallas as pl
from jax.experimental.pallas import tpu as pltpu


def _resblock_kernel(x_ref, w1_ref, b1_ref, w2_ref, b2_ref, o_ref):
    """Processes NB images per grid step.

    x_ref  : (NB, H, W*C)   f32  input, channels-last flattened with W (lane-dense)
    w*_ref : (W*C, 3*W*C)   bf16 block-Toeplitz conv weights (BN scale folded),
                                 kh taps concatenated along the output dim
    b*_ref : (1, W*C)       f32  folded BN shift, tiled over W
    o_ref  : (NB, H, W*C)   f32  output
    """
    NB, H, WC = o_ref.shape
    R = NB * H

    x = x_ref[...].reshape(R, WC)

    # Vertical-boundary masks: hoisted, computed once full-width and reused by both
    # convs; applied with a multiply (no per-where broadcast_in_dim re-emission).
    # Invariant: row r of the (NB*H, WC) flattening has image-height r % H, so the
    # h==0 / h==H-1 rows coincide exactly with per-image top/bottom boundaries.
    h_idx = lax.broadcasted_iota(jnp.int32, (R, WC), 0) % H
    m_top = (h_idx != 0).astype(jnp.float32)
    m_bot = (h_idx != (H - 1)).astype(jnp.float32)

    def conv3x3(inp, w_ref):
        # Single fused MXU matmul (bf16 operands, f32 accumulate). The kw taps and
        # the implicit zero padding along W are folded into the block-Toeplitz
        # weight; the three kh taps live in three 128-aligned column groups.
        a = jnp.dot(inp.astype(jnp.bfloat16), w_ref[...],
                    preferred_element_type=jnp.float32)            # (R, 3*WC)
        a0 = a[:, :WC]
        a1 = a[:, WC:2 * WC]
        a2 = a[:, 2 * WC:]
        # Vertical (kh) shifts in-register via XLU roll + boundary masking.
        top = pltpu.roll(a0, shift=1, axis=0) * m_top
        bot = pltpu.roll(a2, shift=R - 1, axis=0) * m_bot
        return top + a1 + bot

    # conv1 (BN scale folded into weights) + BN shift + ReLU
    y = jnp.maximum(conv3x3(x, w1_ref) + b1_ref[...], 0.0)
    # conv2 + BN shift + residual add + ReLU
    z = conv3x3(y, w2_ref) + b2_ref[...] + x
    o_ref[...] = jnp.maximum(z, 0.0).reshape(NB, H, WC).astype(o_ref.dtype)


def fold_conv_bn(w_oihw, gamma, beta, mean, var, W, eps=1e-5):
    """Fold eval-mode BN into a 3x3 conv and build the fused block-Toeplitz weight.

    Returns:
      w_fused: (W*C, 3*W*C) bf16 — for each kh, the (W*C, W*C) matrix realizing the
               three kw taps incl. the implicit zero padding along W, with the BN
               scale folded into the output channels; concatenated along axis 1.
      shift:   (1, W*C) f32 — BN shift (beta - mean*scale) tiled over W.
    """
    C = w_oihw.shape[0]
    scale = gamma * lax.rsqrt(var + eps)
    w = w_oihw.astype(jnp.float32) * scale[:, None, None, None]
    taps = jnp.transpose(w, (2, 3, 1, 0))             # (kh, kw, Cin, Cout)
    mats = []
    for kh in range(3):
        m = jnp.zeros((W * C, W * C), jnp.float32)
        for kw in range(3):
            # D[w_in, w_out] = 1  iff  w_in == w_out + kw - 1  (i.e. offset 1-kw)
            d = jnp.eye(W, k=1 - kw, dtype=jnp.float32)
            m = m + jnp.kron(d, taps[kh, kw])
        mats.append(m)
    w_fused = jnp.concatenate(mats, axis=1).astype(jnp.bfloat16)   # (WC, 3*WC)
    shift = jnp.tile(beta - mean * scale, W).reshape(1, W * C).astype(jnp.float32)
    return w_fused, shift


def residual_block_flat(x_flat, w1_fused, b1, w2_fused, b2, images_per_step=None):
    """Run the residual block on the lane-dense (N, H, W*C) layout.

    Keep activations in this layout between residual blocks of a tower to avoid a
    per-block NCHW<->flat relayout pass through HBM.
    """
    N, H, WC = x_flat.shape

    if images_per_step is None:
        bytes_per_image = H * WC * 4
        nb_target = max(1, (1 << 20) // bytes_per_image)   # ~1 MiB activations / step
        nb_cap = max(1, (N + 1) // 2)                      # >= 2 steps: both v7x TCs busy
        images_per_step = min(nb_target, nb_cap)
    NB = images_per_step
    n_steps = -(-N // NB)
    Npad = n_steps * NB
    if Npad != N:
        x_flat = jnp.pad(x_flat, ((0, Npad - N), (0, 0), (0, 0)))

    # Scoped-VMEM budget: double-buffered in/out blocks + ~6 live (R, WC|3*WC) f32
    # temporaries + the (double-buffered) bf16 weights.  Clamp to v7x physical VMEM.
    block_bytes = NB * H * WC * 4
    w_bytes = 2 * (w1_fused.size * 2)
    vmem_limit = int(min(64 << 20, max(32 << 20, 24 * block_bytes + 4 * w_bytes)))

    out = pl.pallas_call(
        _resblock_kernel,
        out_shape=jax.ShapeDtypeStruct((Npad, H, WC), jnp.float32),
        grid_spec=pltpu.PrefetchScalarGridSpec(
            num_scalar_prefetch=0,
            grid=(n_steps,),
            in_specs=[
                pl.BlockSpec((NB, H, WC), lambda n: (n, 0, 0)),
                pl.BlockSpec((WC, 3 * WC), lambda n: (0, 0)),
                pl.BlockSpec((1, WC), lambda n: (0, 0)),
                pl.BlockSpec((WC, 3 * WC), lambda n: (0, 0)),
                pl.BlockSpec((1, WC), lambda n: (0, 0)),
            ],
            out_specs=pl.BlockSpec((NB, H, WC), lambda n: (n, 0, 0)),
        ),
        compiler_params=pltpu.CompilerParams(
            dimension_semantics=("parallel",),   # batch axis: shard across TCs (v7x)
            vmem_limit_bytes=vmem_limit,
        ),
    )(x_flat, w1_fused, b1, w2_fused, b2)

    return out[:N]


def residual_block(x_nchw, w1, g1, be1, m1, v1, w2, g2, be2, m2, v2,
                   eps=1e-5, images_per_step=None):
    """NCHW in / NCHW out wrapper matching the PyTorch module (eval-mode BN)."""
    N, C, H, W = x_nchw.shape
    WC = W * C

    w1f, b1 = fold_conv_bn(w1, g1, be1, m1, v1, W, eps)
    w2f, b2 = fold_conv_bn(w2, g2, be2, m2, v2, W, eps)

    # NCHW -> (N, H, W*C): lane-dense channels-last-flattened layout.
    x = jnp.transpose(x_nchw, (0, 2, 3, 1)).reshape(N, H, WC).astype(jnp.float32)
    out = residual_block_flat(x, w1f, b1, w2f, b2, images_per_step)
    out = out.reshape(N, H, W, C)
    return jnp.transpose(out, (0, 3, 1, 2))           # back to NCHW


def _ref_forward(x, w1, g1, be1, m1, v1, w2, g2, be2, m2, v2, eps=1e-5):
    """Pure-JAX f32 reference (NCHW), mirrors the PyTorch forward in eval mode."""
    dn = ("NCHW", "OIHW", "NCHW")

    def conv(a, w):
        return lax.conv_general_dilated(a, w, (1, 1), ((1, 1), (1, 1)),
                                        dimension_numbers=dn)

    def bn(a, g, b, m, v):
        g = g[None, :, None, None]
        b = b[None, :, None, None]
        m = m[None, :, None, None]
        v = v[None, :, None, None]
        return (a - m) * (g * lax.rsqrt(v + eps)) + b

    y = jnp.maximum(bn(conv(x, w1), g1, be1, m1, v1), 0.0)
    z = bn(conv(y, w2), g2, be2, m2, v2) + x
    return jnp.maximum(z, 0.0)


if __name__ == "__main__":
    key = jax.random.PRNGKey(0)
    N, C, H, W = 2, 8, 16, 16   # in_ch == filters (required by the residual add)
    ks = jax.random.split(key, 11)

    x = jax.random.normal(ks[0], (N, C, H, W), jnp.float32)

    # conv weights (PyTorch layout: Cout, Cin, kh, kw), no bias
    w1 = 0.1 * jax.random.normal(ks[1], (C, C, 3, 3), jnp.float32)
    w2 = 0.1 * jax.random.normal(ks[2], (C, C, 3, 3), jnp.float32)

    # BatchNorm params / running stats (eval mode)
    g1 = 1.0 + 0.1 * jax.random.normal(ks[3], (C,), jnp.float32)
    be1 = 0.1 * jax.random.normal(ks[4], (C,), jnp.float32)
    m1 = 0.1 * jax.random.normal(ks[5], (C,), jnp.float32)
    v1 = jnp.abs(jax.random.normal(ks[6], (C,), jnp.float32)) + 0.5
    g2 = 1.0 + 0.1 * jax.random.normal(ks[7], (C,), jnp.float32)
    be2 = 0.1 * jax.random.normal(ks[8], (C,), jnp.float32)
    m2 = 0.1 * jax.random.normal(ks[9], (C,), jnp.float32)
    v2 = jnp.abs(jax.random.normal(ks[10], (C,), jnp.float32)) + 0.5

    out = residual_block(x, w1, g1, be1, m1, v1, w2, g2, be2, m2, v2)
    out = jax.block_until_ready(out)

    ref = _ref_forward(x, w1, g1, be1, m1, v1, w2, g2, be2, m2, v2)
    assert out.shape == (N, C, H, W)
    # Tolerance loosened vs the f32 reference because the kernel uses bf16 MXU
    # operands (f32 accumulation) — expected precision change, not a bug.
    assert jnp.allclose(out, ref, rtol=2e-2, atol=3e-2), (
        float(jnp.max(jnp.abs(out - ref))))

    print("KERNEL_OK")
</pallas_src>

<mosaic_0001>
module attributes {stable_mosaic.version = 11 : i64} {
  func.func @_resblock_kernel(%arg0: i32, %arg1: memref<1x16x128xf32, #tpu.memory_space<vmem>>, %arg2: memref<128x384xbf16, #tpu.memory_space<vmem>>, %arg3: memref<1x128xf32, #tpu.memory_space<vmem>>, %arg4: memref<128x384xbf16, #tpu.memory_space<vmem>>, %arg5: memref<1x128xf32, #tpu.memory_space<vmem>>, %arg6: memref<1x16x128xf32, #tpu.memory_space<vmem>>) attributes {dimension_semantics = [#tpu.dimension_semantics<parallel>], iteration_bounds = array<i64: 2>, scalar_prefetch = 0 : i64, scratch_operands = 0 : i64, tpu.core_type = #tpu.core_type<tc>, window_params = [{transform_indices = @transform_0, window_bounds = array<i64: 1, 16, 128>}, {pipeline_mode = #tpu.pipeline_mode<synchronous>, transform_indices = @transform_1, window_bounds = array<i64: 128, 384>}, {pipeline_mode = #tpu.pipeline_mode<synchronous>, transform_indices = @transform_2, window_bounds = array<i64: 1, 128>}, {pipeline_mode = #tpu.pipeline_mode<synchronous>, transform_indices = @transform_3, window_bounds = array<i64: 128, 384>}, {pipeline_mode = #tpu.pipeline_mode<synchronous>, transform_indices = @transform_4, window_bounds = array<i64: 1, 128>}, {transform_indices = @transform_5, window_bounds = array<i64: 1, 16, 128>}]} {
    %c0 = arith.constant 0 : index
    %c0_0 = arith.constant 0 : index
    %c0_1 = arith.constant 0 : index
    %0 = vector.load %arg1[%c0, %c0_0, %c0_1] : memref<1x16x128xf32, #tpu.memory_space<vmem>>, vector<1x16x128xf32>
    %1 = vector.shape_cast %0 : vector<1x16x128xf32> to vector<16x128xf32>
    %2 = tpu.iota {dimensions = array<i32: 0>} : vector<16x128xi32>
    %c16_i32 = arith.constant 16 : i32
    %c0_i32 = arith.constant 0 : i32
    %3 = arith.cmpi eq, %c16_i32, %c0_i32 : i32
    %c1_i32 = arith.constant 1 : i32
    %4 = arith.select %3, %c1_i32, %c16_i32 : i32
    %5 = vector.broadcast %4 : i32 to vector<16x128xi32>
    %6 = arith.remsi %2, %5 : vector<16x128xi32>
    %c0_i32_2 = arith.constant 0 : i32
    %7 = vector.broadcast %c0_i32_2 : i32 to vector<16x128xi32>
    %8 = arith.cmpi ne, %6, %7 : vector<16x128xi32>
    %c0_i32_3 = arith.constant 0 : i32
    %9 = vector.broadcast %c0_i32_3 : i32 to vector<16x128xi32>
    %10 = arith.cmpi slt, %6, %9 : vector<16x128xi32>
    %c0_i32_4 = arith.constant 0 : i32
    %11 = arith.cmpi slt, %4, %c0_i32_4 : i32
    %12 = vector.broadcast %11 : i1 to vector<16x128xi1>
    %13 = vector.broadcast %12 : vector<16x128xi1> to vector<16x128xi1>
    %14 = arith.xori %10, %13 : vector<16x128xi1>
    %15 = arith.andi %14, %8 : vector<16x128xi1>
    %16 = vector.broadcast %4 : i32 to vector<16x128xi32>
    %17 = arith.addi %6, %16 : vector<16x128xi32>
    %18 = arith.select %15, %17, %6 : vector<16x128xi1>, vector<16x128xi32>
    %c0_i32_5 = arith.constant 0 : i32
    %19 = vector.broadcast %c0_i32_5 : i32 to vector<16x128xi32>
    %20 = arith.cmpi ne, %18, %19 : vector<16x128xi32>
    %21 = arith.extui %20 : vector<16x128xi1> to vector<16x128xi32>
    %22 = arith.sitofp %21 : vector<16x128xi32> to vector<16x128xf32>
    %c15_i32 = arith.constant 15 : i32
    %23 = vector.broadcast %c15_i32 : i32 to vector<16x128xi32>
    %24 = arith.cmpi ne, %18, %23 : vector<16x128xi32>
    %25 = arith.extui %24 : vector<16x128xi1> to vector<16x128xi32>
    %26 = arith.sitofp %25 : vector<16x128xi32> to vector<16x128xf32>
    %27 = arith.truncf %1 : vector<16x128xf32> to vector<16x128xbf16>
    %c0_6 = arith.constant 0 : index
    %c0_7 = arith.constant 0 : index
    %28 = vector.load %arg2[%c0_6, %c0_7] : memref<128x384xbf16, #tpu.memory_space<vmem>>, vector<128x384xbf16>
    %cst = arith.constant dense<0.000000e+00> : vector<16x384xf32>
    %29 = tpu.matmul %27, %28, %cst {dimension_numbers = #tpu.dot_dimension_numbers<[1], [0], [0], [1], [0, 0, 1, 1], [], []>} : vector<16x128xbf16>, vector<128x384xbf16>, vector<16x384xf32> -> vector<16x384xf32>
    %30 = vector.extract_strided_slice %29 {offsets = [0, 0], sizes = [16, 128], strides = [1, 1]} : vector<16x384xf32> to vector<16x128xf32>
    %31 = vector.extract_strided_slice %29 {offsets = [0, 128], sizes = [16, 128], strides = [1, 1]} : vector<16x384xf32> to vector<16x128xf32>
    %32 = vector.extract_strided_slice %29 {offsets = [0, 256], sizes = [16, 128], strides = [1, 1]} : vector<16x384xf32> to vector<16x128xf32>
    %c1_i32_8 = arith.constant 1 : i32
    %33 = tpu.dynamic_rotate %30 by %c1_i32_8 dim 0 : vector<16x128xf32>, i32 -> vector<16x128xf32>
    %34 = arith.mulf %33, %22 : vector<16x128xf32>
    %c15_i32_9 = arith.constant 15 : i32
    %35 = tpu.dynamic_rotate %32 by %c15_i32_9 dim 0 : vector<16x128xf32>, i32 -> vector<16x128xf32>
    %36 = arith.mulf %35, %26 : vector<16x128xf32>
    %37 = arith.addf %34, %31 : vector<16x128xf32>
    %38 = arith.addf %37, %36 : vector<16x128xf32>
    %c0_10 = arith.constant 0 : index
    %c0_11 = arith.constant 0 : index
    %39 = vector.load %arg3[%c0_10, %c0_11] : memref<1x128xf32, #tpu.memory_space<vmem>>, vector<1x128xf32>
    %40 = vector.broadcast %39 : vector<1x128xf32> to vector<16x128xf32>
    %41 = arith.addf %38, %40 : vector<16x128xf32>
    %cst_12 = arith.constant 0.000000e+00 : f32
    %42 = vector.broadcast %cst_12 : f32 to vector<16x128xf32>
    %43 = arith.maximumf %41, %42 : vector<16x128xf32>
    %44 = arith.truncf %43 : vector<16x128xf32> to vector<16x128xbf16>
    %c0_13 = arith.constant 0 : index
    %c0_14 = arith.constant 0 : index
    %45 = vector.load %arg4[%c0_13, %c0_14] : memref<128x384xbf16, #tpu.memory_space<vmem>>, vector<128x384xbf16>
    %cst_15 = arith.constant dense<0.000000e+00> : vector<16x384xf32>
    %46 = tpu.matmul %44, %45, %cst_15 {dimension_numbers = #tpu.dot_dimension_numbers<[1], [0], [0], [1], [0, 0, 1, 1], [], []>} : vector<16x128xbf16>, vector<128x384xbf16>, vector<16x384xf32> -> vector<16x384xf32>
    %47 = vector.extract_strided_slice %46 {offsets = [0, 0], sizes = [16, 128], strides = [1, 1]} : vector<16x384xf32> to vector<16x128xf32>
    %48 = vector.extract_strided_slice %46 {offsets = [0, 128], sizes = [16, 128], strides = [1, 1]} : vector<16x384xf32> to vector<16x128xf32>
    %49 = vector.extract_strided_slice %46 {offsets = [0, 256], sizes = [16, 128], strides = [1, 1]} : vector<16x384xf32> to vector<16x128xf32>
    %c1_i32_16 = arith.constant 1 : i32
    %50 = tpu.dynamic_rotate %47 by %c1_i32_16 dim 0 : vector<16x128xf32>, i32 -> vector<16x128xf32>
    %51 = arith.mulf %50, %22 : vector<16x128xf32>
    %c15_i32_17 = arith.constant 15 : i32
    %52 = tpu.dynamic_rotate %49 by %c15_i32_17 dim 0 : vector<16x128xf32>, i32 -> vector<16x128xf32>
    %53 = arith.mulf %52, %26 : vector<16x128xf32>
    %54 = arith.addf %51, %48 : vector<16x128xf32>
    %55 = arith.addf %54, %53 : vector<16x128xf32>
    %c0_18 = arith.constant 0 : index
    %c0_19 = arith.constant 0 : index
    %56 = vector.load %arg5[%c0_18, %c0_19] : memref<1x128xf32, #tpu.memory_space<vmem>>, vector<1x128xf32>
    %57 = vector.broadcast %56 : vector<1x128xf32> to vector<16x128xf32>
    %58 = arith.addf %55, %57 : vector<16x128xf32>
    %59 = arith.addf %58, %1 : vector<16x128xf32>
    %cst_20 = arith.constant 0.000000e+00 : f32
    %60 = vector.broadcast %cst_20 : f32 to vector<16x128xf32>
    %61 = arith.maximumf %59, %60 : vector<16x128xf32>
    %62 = vector.shape_cast %61 : vector<16x128xf32> to vector<1x16x128xf32>
    %c0_21 = arith.constant 0 : index
    %c0_22 = arith.constant 0 : index
    %c0_23 = arith.constant 0 : index
    %63 = vector.load %arg6[%c0_21, %c0_22, %c0_23] : memref<1x16x128xf32, #tpu.memory_space<vmem>>, vector<1x16x128xf32>
    tpu.vector_store %arg6[%c0_21, %c0_22, %c0_23], %62 {strides = array<i32>} : memref<1x16x128xf32, #tpu.memory_space<vmem>>, vector<1x16x128xf32>,
    return
  }
  func.func @transform_0(%arg0: i32) -> (i32, i32, i32) {
    %c0_i32 = arith.constant 0 : i32
    %c0_i32_0 = arith.constant 0 : i32
    %c0_i32_1 = arith.constant 0 : i32
    return %arg0, %c0_i32, %c0_i32_0 : i32, i32, i32
  }
  func.func @transform_1(%arg0: i32) -> (i32, i32) {
    %c0_i32 = arith.constant 0 : i32
    %c0_i32_0 = arith.constant 0 : i32
    %c0_i32_1 = arith.constant 0 : i32
    return %c0_i32, %c0_i32_0 : i32, i32
  }
  func.func @transform_2(%arg0: i32) -> (i32, i32) {
    %c0_i32 = arith.constant 0 : i32
    %c0_i32_0 = arith.constant 0 : i32
    %c0_i32_1 = arith.constant 0 : i32
    return %c0_i32, %c0_i32_0 : i32, i32
  }
  func.func @transform_3(%arg0: i32) -> (i32, i32) {
    %c0_i32 = arith.constant 0 : i32
    %c0_i32_0 = arith.constant 0 : i32
    %c0_i32_1 = arith.constant 0 : i32
    return %c0_i32, %c0_i32_0 : i32, i32
  }
  func.func @transform_4(%arg0: i32) -> (i32, i32) {
    %c0_i32 = arith.constant 0 : i32
    %c0_i32_0 = arith.constant 0 : i32
    %c0_i32_1 = arith.constant 0 : i32
    return %c0_i32, %c0_i32_0 : i32, i32
  }
  func.func @transform_5(%arg0: i32) -> (i32, i32, i32) {
    %c0_i32 = arith.constant 0 : i32
    %c0_i32_0 = arith.constant 0 : i32
    %c0_i32_1 = arith.constant 0 : i32
    return %arg0, %c0_i32, %c0_i32_0 : i32, i32, i32
  }
}

</mosaic_0001>

<bundles_post_ra>
// kernel: tpu_custom_call.1
= control target key start
LH: loop header
LB: loop body
LE: loop exit
PB: predicated region body
PF: predicated region fallthrough
CT: control target
= control target key end

     0   :  { %10 = vsyncpa [#allocation3], 0  ;;  %s1729_s0 = inlined_call_operand.hbm [shape: f32[2,16,128], index: 0, kind: input, shape index: {}]   ;;  %s1730_s1 = inlined_call_operand.hbm [shape: bf16[128,384], index: 1, kind: input, shape index: {}]   ;;  %s1731_s2 = inlined_call_operand.vmem [shape: f32[1,128], index: 2, kind: input, shape index: {}]   ;;  %s1732_s3 = inlined_call_operand.hbm [shape: bf16[128,384], index: 3, kind: input, shape index: {}]   ;;  %s1733_s4 = inlined_call_operand.vmem [shape: f32[1,128], index: 4, kind: input, shape index: {}]   ;;  %s1734_s5 = inlined_call_operand.hbm [shape: f32[2,16,128], index: 5, kind: output, shape index: {}]  }
   0x1   :  { %12 = vsyncpa [#allocation3 + $0x1], 0 }
   0x2   :  { %13 = vsyncpa [#allocation6], 0 }
   0x3   :  { %14 = vsyncpa [#allocation4], 0 }
   0x4   :  { %16 = vsyncpa [#allocation4 + $0x1], 0  ;;  %s1441_s18 = smov 0   ;;  %s1443_s19 = smov 0  }
   0x5   :  { %s1445_s20 = smov 0   ;;  %s1447_s21 = smov 0  }
   0x6 LB: > { %s1462_s22 = sadd.s32 4294967295, %s1396_s21   ;;  %s970_s23 = sadd.s32 4294967294, %s1396_s21   ;;  %s1396_s21 = sphi %s1447_s21, %s1754_s21   ;;  %s1392_s20 = sphi %s1445_s20, %s1753_s20   ;;  %s1388_s19 = sphi %s1443_s19, %s1752_s19   ;;  %s1384_s18 = sphi %s1441_s18, %s1751_s18  }
   0x7   : > { %p42_p0 = scmp.ne.s32.totalorder %s1388_s19, %s1384_s18  ;;  %p1735_p1 = scmp.eq.s32.totalorder %s1462_s22, 0 }
   0x8   : > { %p156_p3 = scmp.eq.s32.totalorder %s970_s23, 1  ;;  %p971_p5 = scmp.ge.s32.totalorder %s1396_s21, 1 }
   0x9   : > { %p1471_p4 = por %p1735_p1, %p42_p0  ;;  %p163_p7 = scmp.lt.s32.totalorder %s1396_s21, 3 }
   0xa   : > { %p1476_p6 = por %p156_p3, %p42_p0  ;;  %s1398_s27 = smov [#allocation5]  }
   0xb   : > { %s1738_s24 = scalar_select %p1471_p4, 1, 0 }
   0xc   : > { %s1739_s25 = scalar_select %p1476_p6, 1, 0 }
   0xd   : > { %p1481_p8 = pnand %p971_p5, %p163_p7  ;;  %s175_s28 = sshll.u32 %s1398_s27, 4  ;;  %s1485_s28 = int_to_ptr.vmem [resolvable:$true] %s175_s28 }
   0xe   : > { %s1399_s30 = smov [#allocation7]   ;;  %s1240_s9 = scalar_lea.hbm %s1730_s1, 3072 }
   0xf   : > { %p1112_p9 = pneg %p1481_p8  ;;  %s191_s6 = sshll.u32 %s1399_s30, 4  ;;  %s1496_s6 = int_to_ptr.vmem [resolvable:$true] %s191_s6 }
  0x10   : > { %p1241_p12 = scmp.ne.s32.totalorder %s1730_s1, %s1240_s9  ;;  %p1247_p5 = scmp.lt.u32.totalorder %s1240_s9, %s1730_s1 }
  0x11   : > { %p1492_p11 = pnand %p1112_p9, %p1735_p1 }
  0x13   : > { %p1242_p13 = pneg %p1492_p11 }
  0x15   : > { %p1243_p0 = pnand %p1242_p13, %p1241_p12 }
  0x17   : > { %p1244_p3 = pneg %p1243_p0 }
  0x19   : > { %p1249_p7 = pnand %p1247_p5, %p1244_p3 }
  0x1b   : > { %1252 = shalt.err (!%p1249_p7)
}
  0x1c   : > { %s1253_s14 = scalar_lea.vmem %s1485_s28, 3072  ;;  %p1261_p2 = scmp.lt.s32.totalorder %s1485_s28, %s1485_s28 }
  0x1d   : > { %p1254_p9 = scmp.ne.s32.totalorder %s1485_s28, %s1253_s14  ;;  %p1262_p12 = scmp.lt.s32.totalorder %s1253_s14, %s1253_s14 }
  0x1f   : > { %p1256_p10 = pnand %p1254_p9, %p1242_p13  ;;  %p1263_p0 = por %p1262_p12, %p1261_p2 }
  0x21   : > { %p1257_p1 = pneg %p1256_p10 }
  0x23   : > { %p1264_p6 = pnand %p1263_p0, %p1257_p1 }
  0x25   : > { %1267 = shalt.err (!%p1264_p6)
}
  0x26   : > { %s1400_s15 = smov 192   ;;  %s1401_s16 = smov 12  }
  0x27   : > { %1115 = dma.hbm_to_vmem [thread:$0]  (!%p1492_p11), %s1730_s1, 3072, %s1485_s28, [#allocation6], %s1400_s15, %s1400_s15, %s1401_s16  }
  0x28   : > { %s1268_s7 = scalar_lea.hbm %s1732_s3, 3072 }
  0x29   : > { %p1269_p2 = scmp.ne.s32.totalorder %s1732_s3, %s1268_s7  ;;  %p1275_p10 = scmp.lt.u32.totalorder %s1268_s7, %s1732_s3 }
  0x2b   : > { %p1271_p1 = pnand %p1269_p2, %p1242_p13 }
  0x2d   : > { %p1272_p6 = pneg %p1271_p1 }
  0x2f   : > { %p1277_p3 = pnand %p1275_p10, %p1272_p6 }
  0x31   : > { %1280 = shalt.err (!%p1277_p3)
}
  0x32   : > { %s1281_s28 = scalar_lea.vmem %s1496_s6, 3072  ;;  %p1289_p12 = scmp.lt.s32.totalorder %s1496_s6, %s1496_s6 }
  0x33   : > { %p1282_p5 = scmp.ne.s32.totalorder %s1496_s6, %s1281_s28  ;;  %p1290_p0 = scmp.lt.s32.totalorder %s1281_s28, %s1281_s28 }
  0x35   : > { %p1284_p7 = pnand %p1282_p5, %p1242_p13  ;;  %p1291_p2 = por %p1290_p0, %p1289_p12 }
  0x37   : > { %p1285_p9 = pneg %p1284_p7 }
  0x39   : > { %p1292_p1 = pnand %p1291_p2, %p1285_p9 }
  0x3b   : > { %1295 = shalt.err (!%p1292_p1)
}
  0x3c   : > { %1118 = dma.hbm_to_vmem [thread:$0]  (!%p1492_p11), %s1732_s3, 3072, %s1496_s6, [#allocation6], %s1400_s15, %s1400_s15, %s1401_s16  }
  0x3d   : > { %s1551_s14 = sadd.s32 1, %s1396_s21   ;;  %s29_s29 = sadd.s32 1, %s1392_s20 }
  0x3e   : > { %s26_s17 = ssub.s32 %s1396_s21, %s1551_s14  ;;  %p36_p13 = scmp.ne.s32.totalorder %s1392_s20, %s1388_s19 }
  0x3f   : > { %p27_p6 = scmp.eq.s32.totalorder %s26_s17, 0  ;;  %p37_p10 = scmp.eq.s32.totalorder %s1396_s21, 0 }
  0x40   : > { %p1742_p3 = scmp.eq.s32.totalorder %s1462_s22, 1  ;;  %p1129_p7 = scmp.lt.s32.totalorder %s1396_s21, 2 }
  0x41   : > { %s1567_s27 = scalar_select %p27_p6, %s1392_s20, %s29_s29  }
  0x42   : > { %p1561_p5 = por %p1742_p3, %p36_p13  ;;  %p38_p9 = por %p37_p10, %p36_p13 }
  0x43   : > { %s208_s30 = sand.u32 1, %s1392_s20   ;;  %s1040_s6 = sshll.u32 %s1396_s21, 8 }
  0x44   : > { %s1743_s23 = scalar_select %p1561_p5, 1, 0 }
  0x45   : > { %s975_s7 = sshll.u32 %s208_s30, 4  ;;  %s1574_s8 = scalar_lea.hbm %s1729_s0, %s1040_s6 }
  0x46   : > { %s212_s9 = scalar_lea.vmem [#allocation2], %s975_s7  ;;  %p1578_p11 = pnand %p1129_p7, %p38_p9 }
  0x47   : > { %s219_s10 = sshll.u32 %s212_s9, 4  ;;  %s1582_s28 = scalar_lea.sflag [#allocation3], %s208_s30  ;;  %s1576_s10 = int_to_ptr.vmem [resolvable:$true] %s219_s10 }
  0x48   : > { %s1296_s12 = scalar_lea.hbm %s1574_s8, 256  ;;  %p1298_p0 = pneg %p1578_p11 }
  0x49   : > { %p1297_p12 = scmp.ne.s32.totalorder %s1574_s8, %s1296_s12  ;;  %s1301_s17 = scalar_lea.hbm %s1729_s0, 512 }
  0x4a   : > { %p1302_p13 = scmp.lt.u32.totalorder %s1574_s8, %s1729_s0  ;;  %p1303_p6 = scmp.lt.u32.totalorder %s1301_s17, %s1296_s12 }
  0x4b   : > { %p1299_p2 = pnand %p1298_p0, %p1297_p12  ;;  %p1305_p3 = scmp.lt.u32.totalorder %s1296_s12, %s1574_s8 }
  0x4c   : > { %p1304_p10 = por %p1303_p6, %p1302_p13 }
  0x4d   : > { %p1300_p1 = pneg %p1299_p2 }
  0x4e   : > { %p1306_p7 = por %p1305_p3, %p1304_p10 }
  0x50   : > { %p1307_p9 = pnand %p1306_p7, %p1300_p1 }
  0x52   : > { %1310 = shalt.err (!%p1307_p9)
}
  0x53   : > { %s1311_s30 = scalar_lea.vmem %s1576_s10, 256  ;;  %s1402_s15 = smov [#allocation2]  }
  0x54   : > { %p1312_p12 = scmp.ne.s32.totalorder %s1576_s10, %s1311_s30  ;;  %s1316_s16 = sshll.u32 %s1402_s15, 4  ;;  %s1317_s16 = int_to_ptr.vmem [resolvable:$false] %s1316_s16 }
  0x55   : > { %s1318_s9 = scalar_lea.vmem %s1317_s16, 512  ;;  %p1319_p4 = scmp.lt.s32.totalorder %s1576_s10, %s1317_s16 }
  0x56   : > { %p1314_p2 = pnand %p1312_p12, %p1298_p0  ;;  %p1320_p13 = scmp.lt.s32.totalorder %s1318_s9, %s1311_s30 }
  0x58   : > { %p1315_p5 = pneg %p1314_p2  ;;  %p1321_p6 = por %p1320_p13, %p1319_p4 }
  0x5a   : > { %p1322_p10 = pnand %p1321_p6, %p1315_p5 }
  0x5c   : > { %1325 = shalt.err (!%p1322_p10)
}
  0x5d   : > { %s1403_s12 = smov 128   ;;  %s1404_s13 = smov 8  }
  0x5e   : > { %1122 = dma.hbm_to_vmem [thread:$0]  (!%p1578_p11), %s1574_s8, 256, %s1576_s10, %s1582_s28, %s1403_s12, %s1403_s12, %s1404_s13  }
  0x5f   : > { %231 = sbr.rel (%p1481_p8) target bundleno = 613 (0x265), region = 40  ;;  %s1613_s29 = sand.u32 (!%p1481_p8), 1, %s1388_s19  }
  0x60   : > { %s979_s17 = sshll.u32 (!%p1481_p8), %s1613_s29, 4  ;;  %s234_s7 = scalar_lea.sflag (!%p1481_p8), [#allocation3], %s1613_s29 }
  0x61   : > { %s1619_s6 = scalar_lea.vmem (!%p1481_p8), [#allocation2], %s979_s17  ;;  %p1745_p4 = scmp.ne.s32.totalorder (!%p1481_p8), %s1738_s24, 0 }
  0x66   : > { %1371 = dma.done.wait (%p1745_p4), %s234_s7, 256  }
  0x67   : > { %1373 = vsyncadd (%p1745_p4), %s234_s7, 4294967040  ;;  %p1746_p5 = scmp.eq.s32.totalorder %s1462_s22, 0 }
  0x69   : > { %1375 = dma.done.wait (%p1746_p5), [#allocation6], 6144   ;;  %p1747_p8 = pmov %p1746_p5 }
  0x6a   : > { %v1405_v0 = vmov 0.0   ;;  %vm1406_vm0 = vmmov 0   ;;  %v1407_v1 = vmov 0   ;;  %v1176_v2 = vld [vmem:[#allocation5 + $0x4] ss:$12 sps:$4 sm:$0xff]   ;;  %v1643_v27 = vld [vmem:[%s1619_s6 + $0x8] sm:$0xff]  ;;  %v275_v53 = vlaneseq }
  0x6b   : > { %1377 = vsyncadd (%p1747_p8), [#allocation6], 4294961152  ;;  %1060 = vmatprep.subr.bf16.mxu1 %v1405_v0  ;;  %1076 = vmatprep.mubr.msk.bf16.mxu1 %vm1406_vm0, %v1405_v0  ;;  %v1178_v3 = vld [vmem:[#allocation5 + $0x8] ss:$12 sps:$4 sm:$0xff]   ;;  %v1179_v4 = vld [vmem:[#allocation5] ss:$12 sps:$4 sm:$0xff]  }
  0x6c   : > { %507 = vmatprep.mubr.bf16.mxu0 %v1407_v1  ;;  %475 = vmatprep.subr.bf16.mxu0 %v1176_v2  ;;  %v1180_v5 = vld [vmem:[#allocation5 + $0x1c] ss:$12 sps:$4 sm:$0xff]   ;;  %v1182_v6 = vld [vmem:[#allocation5 + $0x20] ss:$12 sps:$4 sm:$0xff]   ;;  %v1183_v7 = vld [vmem:[#allocation5 + $0x18] ss:$12 sps:$4 sm:$0xff]  }
  0x6d   : > { %1061 = vmatpush3.bf16.msra.mxu1 %v1178_v3  ;;  %476 = vmatpush1.bf16.msra.mxu0 %v1179_v4  ;;  %v1184_v8 = vld [vmem:[#allocation5 + $0x34] ss:$12 sps:$4 sm:$0xff]   ;;  %v1186_v9 = vld [vmem:[#allocation5 + $0x38] ss:$12 sps:$4 sm:$0xff]   ;;  %v1187_v10 = vld [vmem:[#allocation5 + $0x30] ss:$12 sps:$4 sm:$0xff]  }
  0x6e   : > { %1062 = vmatprep.subr.bf16.mxu1 %v1405_v0  ;;  %477 = vmatprep.subr.bf16.mxu0 %v1180_v5  ;;  %v1188_v11 = vld [vmem:[#allocation5 + $0x4c] ss:$12 sps:$4 sm:$0xff]   ;;  %v1190_v12 = vld [vmem:[#allocation5 + $0x50] ss:$12 sps:$4 sm:$0xff]   ;;  %v1191_v13 = vld [vmem:[#allocation5 + $0x48] ss:$12 sps:$4 sm:$0xff]  }
  0x6f   : > { %v1192_v14 = vld [vmem:[#allocation5 + $0x64] ss:$12 sps:$4 sm:$0xff]   ;;  %v1194_v15 = vld [vmem:[#allocation5 + $0x68] ss:$12 sps:$4 sm:$0xff]   ;;  %v1195_v16 = vld [vmem:[#allocation5 + $0x60] ss:$12 sps:$4 sm:$0xff]  }
  0x70   : > { %v1196_v17 = vld [vmem:[#allocation5 + $0x7c] ss:$12 sps:$4 sm:$0xff]   ;;  %v1198_v18 = vld [vmem:[#allocation5 + $0x80] ss:$12 sps:$4 sm:$0xff]   ;;  %v1199_v19 = vld [vmem:[#allocation5 + $0x78] ss:$12 sps:$4 sm:$0xff]  }
  0x71   : > { %1063 = vmatpush3.bf16.msra.mxu1 %v1182_v6  ;;  %478 = vmatpush1.bf16.msra.mxu0 %v1183_v7  ;;  %v1200_v20 = vld [vmem:[#allocation5 + $0x94] ss:$12 sps:$4 sm:$0xff]   ;;  %v1202_v21 = vld [vmem:[#allocation5 + $0x98] ss:$12 sps:$4 sm:$0xff]   ;;  %v1203_v22 = vld [vmem:[#allocation5 + $0x90] ss:$12 sps:$4 sm:$0xff]  }
  0x72   : > { %1064 = vmatprep.subr.bf16.mxu1 %v1405_v0  ;;  %479 = vmatprep.subr.bf16.mxu0 %v1184_v8  ;;  %v1204_v23 = vld [vmem:[#allocation5 + $0xac] ss:$12 sps:$4 sm:$0xff]   ;;  %v1206_v24 = vld [vmem:[#allocation5 + $0xb0] ss:$12 sps:$4 sm:$0xff]   ;;  %v1207_v25 = vld [vmem:[#allocation5 + $0xa8] ss:$12 sps:$4 sm:$0xff]  }
  0x73   : > { %v1640_v26 = vld [vmem:[%s1619_s6] sm:$0xff]  ;;  %v1214_v32 = vld [vmem:[#allocation7 + $0x1c] ss:$12 sps:$4 sm:$0xff]   ;;  %v1222_v38 = vld [vmem:[#allocation7 + $0x4c] ss:$12 sps:$4 sm:$0xff]   ;;  %v276_v54 = vshrl.u32 %v275_v53, 7 }
  0x74   : > { %v1210_v28 = vld [vmem:[#allocation7 + $0x4] ss:$12 sps:$4 sm:$0xff]   ;;  %v1211_v29 = vld [vmem:[#allocation7 + $0x8] ss:$12 sps:$4 sm:$0xff]   ;;  %v314_v30 = vpack.c.bf16 %v1643_v27, %v1640_v26  ;;  %v1208_v31 = vld [vmem:[#allocation7] ss:$12 sps:$4 sm:$0xff]  }
  0x75   : > { %1065 = vmatpush3.bf16.msra.mxu1 %v1186_v9  ;;  %480 = vmatpush1.bf16.msra.mxu0 %v1187_v10  ;;  %v1215_v33 = vld [vmem:[#allocation7 + $0x20] ss:$12 sps:$4 sm:$0xff]   ;;  %v1212_v34 = vld [vmem:[#allocation7 + $0x18] ss:$12 sps:$4 sm:$0xff]   ;;  %v1216_v37 = vld [vmem:[#allocation7 + $0x30] ss:$12 sps:$4 sm:$0xff]  }
  0x76   : > { %1066 = vmatprep.subr.bf16.mxu1 %v1405_v0  ;;  %481 = vmatprep.subr.bf16.mxu0 %v1188_v11  ;;  %v1218_v35 = vld [vmem:[#allocation7 + $0x34] ss:$12 sps:$4 sm:$0xff]   ;;  %v1219_v36 = vld [vmem:[#allocation7 + $0x38] ss:$12 sps:$4 sm:$0xff]   ;;  %v1223_v40 = vld [vmem:[#allocation7 + $0x50] ss:$12 sps:$4 sm:$0xff]  }
  0x77   : > { %v1220_v39 = vld [vmem:[#allocation7 + $0x48] ss:$12 sps:$4 sm:$0xff]   ;;  %v1226_v41 = vld [vmem:[#allocation7 + $0x64] ss:$12 sps:$4 sm:$0xff]   ;;  %v1224_v42 = vld [vmem:[#allocation7 + $0x60] ss:$12 sps:$4 sm:$0xff]  }
  0x78   : > { %v1227_v43 = vld [vmem:[#allocation7 + $0x68] ss:$12 sps:$4 sm:$0xff]   ;;  %v1228_v45 = vld [vmem:[#allocation7 + $0x78] ss:$12 sps:$4 sm:$0xff]   ;;  %v1231_v46 = vld [vmem:[#allocation7 + $0x80] ss:$12 sps:$4 sm:$0xff]  }
  0x79   : > { %1067 = vmatpush3.bf16.msra.mxu1 %v1190_v12  ;;  %482 = vmatpush1.bf16.msra.mxu0 %v1191_v13  ;;  %v1230_v44 = vld [vmem:[#allocation7 + $0x7c] ss:$12 sps:$4 sm:$0xff]   ;;  %v1234_v47 = vld [vmem:[#allocation7 + $0x94] ss:$12 sps:$4 sm:$0xff]   ;;  %v1235_v49 = vld [vmem:[#allocation7 + $0x98] ss:$12 sps:$4 sm:$0xff]  }
  0x7a   : > { %1068 = vmatprep.subr.bf16.mxu1 %v1405_v0  ;;  %483 = vmatprep.subr.bf16.mxu0 %v1192_v14  ;;  %v1232_v48 = vld [vmem:[#allocation7 + $0x90] ss:$12 sps:$4 sm:$0xff]   ;;  %v1238_v50 = vld [vmem:[#allocation7 + $0xac] ss:$12 sps:$4 sm:$0xff]   ;;  %v1236_v51 = vld [vmem:[#allocation7 + $0xa8] ss:$12 sps:$4 sm:$0xff]  }
  0x7b   : > { %v1239_v52 = vld [vmem:[#allocation7 + $0xb0] ss:$12 sps:$4 sm:$0xff]   ;;  %v277_v55 = vadd.s32 8, %v276_v54  ;;  %v282_v57 = vand.u32 15, %v276_v54  ;;  %vm568_vm3 = vcmp.lt.s32.totalorder %v276_v54, 7  ;;  %vm561_vm4 = vcmp.lt.s32.totalorder %v276_v54, 1 }
  0x7c   : > { %s1041_s11 = sshll.u32 %s1462_s22, 8  ;;  %s271_s28 = scalar_lea.vmem [#allocation8], %s979_s17 }
  0x7d   : > { %1069 = vmatpush3.bf16.msra.mxu1 %v1194_v15  ;;  %484 = vmatpush1.bf16.msra.mxu0 %v1195_v16  ;;  %v289_v56 = vand.u32 15, %v277_v55  ;;  %vm302_vm2 = vcmp.ne.s32.totalorder %v282_v57, 0  ;;  %v1009_v16 = vld [vmem:[%s1731_s2] ss:$0 sm:$0xff]  ;;  %s878_s30 = sshll.u32 %s271_s28, 4  ;;  %s1683_s9 = scalar_lea.hbm %s1734_s5, %s1041_s11  ;;  %s1685_s30 = int_to_ptr.vmem [resolvable:$true] %s878_s30 }
  0x7e   : > { %1070 = vmatprep.subr.bf16.mxu1 %v1405_v0  ;;  %485 = vmatprep.subr.bf16.mxu0 %v1196_v17  ;;  %v983_v6 = vsel %vm302_vm2, 1.0, %v1405_v0  ;;  %s865_s22 = scalar_lea.sflag [#allocation4], %s1613_s29  ;;  %s1326_s12 = scalar_lea.vmem %s1685_s30, 256 }
  0x7f   : > { %vm309_vm1 = vcmp.ne.s32.totalorder %v289_v56, 15  ;;  %p1327_p11 = scmp.ne.s32.totalorder %s1685_s30, %s1326_s12  ;;  %p1748_p0 = scmp.ne.s32.totalorder %s1743_s23, 0 }
  0x80   : > { %v984_v4 = vsel %vm309_vm1, 1.0, %v1405_v0  ;;  %s1408_s13 = smov [#allocation8]  }
  0x81   : > { %1071 = vmatpush3.bf16.msra.mxu1 %v1198_v18  ;;  %486 = vmatpush1.bf16.msra.mxu0 %v1199_v19  ;;  %p1328_p1 = pnand %p1327_p11, %p1748_p0  ;;  %s1330_s17 = sshll.u32 %s1408_s13, 4  ;;  %s1331_s17 = int_to_ptr.vmem [resolvable:$false] %s1330_s17 }
  0x82   : > { %1072 = vmatprep.subr.bf16.mxu1 %v1405_v0  ;;  %487 = vmatprep.subr.bf16.mxu0 %v1200_v20  ;;  %s1332_s7 = scalar_lea.vmem %s1331_s17, 512  ;;  %p1333_p7 = scmp.lt.s32.totalorder %s1685_s30, %s1331_s17 }
  0x83   : > { %p1329_p3 = pneg %p1328_p1  ;;  %p1334_p9 = scmp.lt.s32.totalorder %s1332_s7, %s1326_s12 }
  0x85   : > { %1073 = vmatpush3.bf16.msra.mxu1 %v1202_v21  ;;  %488 = vmatpush1.bf16.msra.mxu0 %v1203_v22  ;;  %p1335_p12 = por %p1334_p9, %p1333_p7 }
  0x86   : > { %1074 = vmatprep.subr.bf16.mxu1 %v1405_v0  ;;  %489 = vmatprep.subr.bf16.mxu0 %v1204_v23 }
  0x87   : > { %p1336_p2 = pnand %p1335_p12, %p1329_p3 }
  0x89   : > { %1075 = vmatpush3.bf16.msra.mxu1 %v1206_v24  ;;  %490 = vmatpush1.bf16.msra.mxu0 %v1207_v25 }
  0x8a   : > { %1080 = vmatprep.subr.bf16.mxu1 %v1405_v0  ;;  %749 = vmatprep.subr.bf16.mxu0 %v1210_v28 }
  0x8c   : > { %1077 = vmatmul.mubr.bf16.vlgmr.msra.gmra.mrb[0].mxu1 %v314_v30  ;;  %508 = vmatmul.mubr.bf16.vlgmr.msra.gmra.mrb[0].mxu0 %v314_v30 }
  0x8d   : > { %1081 = vmatpush3.bf16.msra.mxu1 %v1211_v29  ;;  %750 = vmatpush1.bf16.msra.mxu0 %v1208_v31 }
  0x8e   : > { %1082 = vmatprep.subr.bf16.mxu1 %v1405_v0  ;;  %751 = vmatprep.subr.bf16.mxu0 %v1214_v32 }
  0x8f   : > { %781 = vmatprep.mubr.bf16.mxu0 %v1407_v1  ;;  %1096 = vmatprep.mubr.msk.bf16.mxu1 %vm1406_vm0, %v1405_v0 }
  0x91   : > { %1083 = vmatpush3.bf16.msra.mxu1 %v1215_v33  ;;  %752 = vmatpush1.bf16.msra.mxu0 %v1212_v34 }
  0x92   : > { %1084 = vmatprep.subr.bf16.mxu1 %v1405_v0  ;;  %753 = vmatprep.subr.bf16.mxu0 %v1218_v35 }
  0x95   : > { %1085 = vmatpush3.bf16.msra.mxu1 %v1219_v36  ;;  %754 = vmatpush1.bf16.msra.mxu0 %v1216_v37 }
  0x96   : > { %1086 = vmatprep.subr.bf16.mxu1 %v1405_v0  ;;  %755 = vmatprep.subr.bf16.mxu0 %v1222_v38 }
  0x99   : > { %756 = vmatpush1.bf16.msra.mxu0 %v1220_v39  ;;  %1087 = vmatpush3.bf16.msra.mxu1 %v1223_v40 }
  0x9a   : > { %1088 = vmatprep.subr.bf16.mxu1 %v1405_v0  ;;  %757 = vmatprep.subr.bf16.mxu0 %v1226_v41 }
  0x9d   : > { %758 = vmatpush1.bf16.msra.mxu0 %v1224_v42  ;;  %1089 = vmatpush3.bf16.msra.mxu1 %v1227_v43 }
  0x9e   : > { %1090 = vmatprep.subr.bf16.mxu1 %v1405_v0  ;;  %759 = vmatprep.subr.bf16.mxu0 %v1230_v44 }
  0xa1   : > { %760 = vmatpush1.bf16.msra.mxu0 %v1228_v45  ;;  %1091 = vmatpush3.bf16.msra.mxu1 %v1231_v46  ;;  %v1034_v45 = vld [vmem:[%s1733_s4] ss:$0 sm:$0xff] }
  0xa2   : > { %1092 = vmatprep.subr.bf16.mxu1 %v1405_v0  ;;  %761 = vmatprep.subr.bf16.mxu0 %v1234_v47 }
  0xa5   : > { %762 = vmatpush1.bf16.msra.mxu0 %v1232_v48  ;;  %1093 = vmatpush3.bf16.msra.mxu1 %v1235_v49 }
  0xa6   : > { %1094 = vmatprep.subr.bf16.mxu1 %v1405_v0  ;;  %763 = vmatprep.subr.bf16.mxu0 %v1238_v50 }
  0xa9   : > { %764 = vmatpush1.bf16.msra.mxu0 %v1236_v51  ;;  %1095 = vmatpush3.bf16.msra.mxu1 %v1239_v52 }
 0x15f   : > { %v552_v58 = vpop.f32.mrb[0].mxu1  ;;  %v509_v60 = vpop.f32.mrb[0].mxu0 }
 0x160   : > { %v566_v59 = vrot.slane %v552_v58, 1  ;;  %v1078_v61 = vpop.f32.mrb[1].mxu1  ;;  %v511_v62 = vpop.f32.mrb[1].mxu0  ;;  %v559_v5 = vrot.slane %v509_v60, 7 }
 0x161   : > { %v555_v63 = vpop.f32.mrb[2].mxu1  ;;  %v513_v2 = vpop.f32.mrb[2].mxu0 }
 0x162   : > { %v567_v1 = vrot.slane %v555_v63, 1  ;;  %v1079_v3 = vpop.f32.mrb[3].mxu1  ;;  %v560_v7 = vrot.slane %v513_v2, 7  ;;  %v515_v8 = vpop.f32.mrb[3].mxu0 }
 0x164   : > { %v569_v9 = vsel %vm568_vm3, %v566_v59, %v567_v1  ;;  %v570_v10 = vsel %vm568_vm3, %v567_v1, %v566_v59  ;;  %v563_v11 = vsel %vm561_vm4, %v560_v7, %v559_v5  ;;  %v562_v12 = vsel %vm561_vm4, %v559_v5, %v560_v7 }
 0x165   : > { %v572_v13 = vmul.f32 %v984_v4, %v570_v10  ;;  %v564_v14 = vmul.f32 %v983_v6, %v563_v11  ;;  %v574_v15 = vadd.f32 %v562_v12, %v515_v8 }
 0x167   : > { %v573_v17 = vadd.f32 %v564_v14, %v511_v62  ;;  %v576_v18 = vadd.f32 %v574_v15, %v572_v13 }
 0x169   : > { %v575_v0 = vadd.f32 %v573_v17, %v569_v9  ;;  %v585_v19 = vadd.f32 %v1009_v16, %v576_v18 }
 0x16b   : > { %v584_v20 = vadd.f32 %v1009_v16, %v575_v0  ;;  %v587_v22 = vmax.f32 %v585_v19, 0.0 }
 0x16d   : > { %v586_v21 = vmax.f32 %v584_v20, 0.0 }
 0x16f   : > { %v588_v23 = vpack.c.bf16 %v587_v22, %v586_v21 }
 0x171   : > { %782 = vmatmul.mubr.bf16.vlgmr.msra.gmra.mrb[4].mxu0 %v588_v23  ;;  %1097 = vmatmul.mubr.bf16.vlgmr.msra.gmra.mrb[4].mxu1 %v588_v23 }
 0x244   : > { %v783_v24 = vpop.f32.mrb[4].mxu0  ;;  %v826_v25 = vpop.f32.mrb[4].mxu1 }
 0x245   : > { %v785_v28 = vpop.f32.mrb[5].mxu0  ;;  %v1098_v29 = vpop.f32.mrb[5].mxu1  ;;  %v833_v32 = vrot.slane %v783_v24, 7  ;;  %v839_v33 = vrot.slane %v826_v25, 1 }
 0x246   : > { %v787_v30 = vpop.f32.mrb[6].mxu0  ;;  %v829_v31 = vpop.f32.mrb[6].mxu1 }
 0x247   : > { %v834_v34 = vrot.slane %v787_v30, 7  ;;  %v840_v35 = vrot.slane %v829_v31, 1  ;;  %v789_v36 = vpop.f32.mrb[7].mxu0  ;;  %v1099_v37 = vpop.f32.mrb[7].mxu1 }
 0x249   : > { %v836_v38 = vsel %vm561_vm4, %v834_v34, %v833_v32  ;;  %v841_v39 = vsel %vm568_vm3, %v839_v33, %v840_v35  ;;  %v842_v40 = vsel %vm568_vm3, %v840_v35, %v839_v33  ;;  %v835_v41 = vsel %vm561_vm4, %v833_v32, %v834_v34 }
 0x24a   : > { %v837_v42 = vmul.f32 %v983_v6, %v836_v38  ;;  %v844_v43 = vmul.f32 %v984_v4, %v842_v40  ;;  %v846_v44 = vadd.f32 %v835_v41, %v789_v36 }
 0x24c   : > { %v845_v46 = vadd.f32 %v837_v42, %v785_v28  ;;  %v848_v47 = vadd.f32 %v846_v44, %v844_v43 }
 0x24e   : > { %v847_v48 = vadd.f32 %v845_v46, %v841_v39  ;;  %v857_v49 = vadd.f32 %v1034_v45, %v848_v47 }
 0x250   : > { %v856_v50 = vadd.f32 %v1034_v45, %v847_v48  ;;  %v859_v51 = vadd.f32 %v857_v49, %v1643_v27 }
 0x252   : > { %v858_v52 = vadd.f32 %v856_v50, %v1640_v26  ;;  %v861_v53 = vmax.f32 %v859_v51, 0.0 }
 0x254   : > { %v860_v54 = vmax.f32 %v858_v52, 0.0  ;;  %863 = vst [vmem:[%s271_s28 + $0x8] sm:$0xff] %v861_v53 }
 0x256   : > { %862 = vst [vmem:[%s271_s28] sm:$0xff] %v860_v54 }
 0x257   : > { %1339 = shalt.err (!%p1336_p2)
}
 0x258   : > { %s1340_s6 = scalar_lea.hbm %s1683_s9, 256  ;;  %s1344_s8 = scalar_lea.hbm %s1734_s5, 512 }
 0x259   : > { %p1341_p13 = scmp.ne.s32.totalorder %s1683_s9, %s1340_s6  ;;  %p1345_p4 = scmp.lt.u32.totalorder %s1683_s9, %s1734_s5 }
 0x25a   : > { %p1346_p5 = scmp.lt.u32.totalorder %s1344_s8, %s1340_s6  ;;  %p1348_p11 = scmp.lt.u32.totalorder %s1340_s6, %s1683_s9 }
 0x25b   : > { %p1342_p6 = pnand %p1341_p13, %p1748_p0 }
 0x25c   : > { %p1347_p8 = por %p1346_p5, %p1345_p4 }
 0x25d   : > { %p1343_p10 = pneg %p1342_p6 }
 0x25e   : > { %p1349_p1 = por %p1348_p11, %p1347_p8 }
 0x260   : > { %p1350_p3 = pnand %p1349_p1, %p1343_p10 }
 0x262   : > { %1353 = shalt.err (!%p1350_p3)
}
 0x263   : > { %s1409_s28 = smov 128   ;;  %s1410_s15 = smov 8  }
 0x264   : > { %1110 = dma.vmem_to_hbm [thread:$0]  (%p1748_p0), %s1685_s30, 256, %s1683_s9, %s865_s22, %s1409_s28, %s1409_s28, %s1410_s15  }
 0x265 PF: > { %s893_s16 = sand.u32 1, %s1384_s18   ;;  %p1749_p7 = scmp.ne.s32.totalorder %s1739_s25, 0 }
 0x266   : > { %p1750_p9 = scmp.ge.s32.totalorder %s1396_s21, 2  ;;  %s894_s12 = scalar_lea.sflag [#allocation4], %s893_s16 }
 0x268   : > { %p1124_p12 = pnand %p1750_p9, %p1749_p7 }
 0x26a   : > { %1379 = dma.done.wait (!%p1124_p12), %s894_s12, 256  }
 0x26b   : > { %1381 = vsyncadd (!%p1124_p12), %s894_s12, 4294967040  ;;  %p19_p2 = scmp.ge.s32.totalorder %s1551_s14, 4   ;;  %s1751_s18 = smov %s1388_s19 }
 0x26c   : > { %s1752_s19 = smov %s1392_s20  ;;  %s1753_s20 = smov %s1567_s27 }
 0x26d   : > { %s1754_s21 = smov %s1551_s14  ;;  %21 = sbr.rel (!%p19_p2) target bundleno = 6 (0x6), region = 93 }
 0x274   :  { %899 = vsyncpa [#allocation3], 1 }
 0x275   :  { %901 = vsyncpa [#allocation3 + $0x1], 1 }
 0x276   :  { %902 = vsyncpa [#allocation6], 1 }
 0x277   :  { %903 = vsyncpa [#allocation4], 1 }
 0x278   :  { %905 = vsyncpa [#allocation4 + $0x1], 1 }

</bundles_post_ra>
